<compile_context>
chip_gen: v7x
topology: tpu7x:2x2x1
jax: 0.10.0
libtpu: 0.0.40
codegen_flags: <defaults>
</compile_context>

<pallas_src>
import functools

import jax
import jax.numpy as jnp
from jax import lax
from jax.experimental import pallas as pl
from jax.experimental.pallas import tpu as pltpu

LN_EPS = 1e-5  # PyTorch nn.LayerNorm default


def patch_embed_kernel(x_ref, g_ref, b_ref, o_ref, *, pool_k, c_real):
    # x_ref block: (1, K, tWh, Ww, Cp)   tap-major pooling windows, channels-last
    # g_ref/b_ref: (1, Cp)               LayerNorm affine params (zero in pad lanes)
    # o_ref block: (1, tWh, Ww, Cp)
    first = x_ref[0, 0]                       # (tWh, Ww, Cp)
    mx = first
    sm = first.astype(jnp.float32)
    for k in range(1, pool_k):                # static unroll over the ps*ps taps
        tap = x_ref[0, k]                     # plain leading-axis index, no relayout
        mx = jnp.maximum(mx, tap)
        sm = sm + tap.astype(jnp.float32)

    # 0.5 * (maxpool + avgpool), accumulated in f32
    y = 0.5 * (mx.astype(jnp.float32) + sm * (1.0 / pool_k))

    # LayerNorm over channels (lane axis).  Channel-pad lanes of y are exactly
    # zero, so summing over all Cp lanes and dividing by the real C is exact.
    inv_c = 1.0 / c_real
    mu = jnp.sum(y, axis=-1, keepdims=True) * inv_c
    ex2 = jnp.sum(y * y, axis=-1, keepdims=True) * inv_c
    var = jnp.maximum(ex2 - mu * mu, 0.0)
    out = (y - mu) * lax.rsqrt(var + LN_EPS) * g_ref[...] + b_ref[...]
    o_ref[0] = out.astype(o_ref.dtype)


def _cdiv(a, b):
    return -(-a // b)


def _round_up(a, b):
    return _cdiv(a, b) * b


def _choose_row_tile(batch, wh, ww, pool_k, cp, itemsize,
                     target_block_bytes=4 * 1024 * 1024):
    """Pooled-output rows per grid step: largest tile under the byte budget,
    shrunk if needed so the grid still has enough steps to feed 2 TensorCores."""
    bytes_per_row = pool_k * ww * cp * itemsize
    twh = int(max(1, min(wh, target_block_bytes // max(bytes_per_row, 1))))
    while twh > 1 and batch * _cdiv(wh, twh) < 4:
        twh = max(1, twh // 2)
    return twh


def patch_embed_forward(x, gamma, beta, patch_size=4):
    """x: (B, C, H, W) NCHW; gamma/beta: LayerNorm(dim) params with dim == C."""
    B, C, H, W = x.shape
    ps = patch_size
    K = ps * ps
    itemsize = jnp.dtype(x.dtype).itemsize

    # Lane-dense channels: pad C up to a multiple of 128; zero gamma/beta in the
    # pad lanes keep the padded outputs exactly zero (sliced off at the end).
    Cp = _round_up(C, 128)
    gamma2 = jnp.zeros((1, Cp), jnp.float32).at[0, :C].set(
        jnp.asarray(gamma, jnp.float32))
    beta2 = jnp.zeros((1, Cp), jnp.float32).at[0, :C].set(
        jnp.asarray(beta, jnp.float32))

    # Output spatial size after the module's (right/bottom, zero) padding.
    Wh = _cdiv(H, ps)
    Ww = _cdiv(W, ps)
    Wp = Ww * ps

    # Row tile + grid; pad H further so Wh divides evenly into row tiles.
    tWh = _choose_row_tile(B, Wh, Ww, K, Cp, itemsize)
    Wh2 = _round_up(Wh, tWh)
    Hp2 = Wh2 * ps

    pad_h = Hp2 - H
    pad_w = Wp - W
    pad_c = Cp - C
    if pad_h or pad_w or pad_c:
        x = jnp.pad(x, ((0, 0), (0, pad_c), (0, pad_h), (0, pad_w)))

    # Exactly one HBM copy: a single transpose that puts channels on the lane
    # axis AND makes the ps*ps pooling taps a plain leading axis.
    #   xw[b, i*ps + j, h, w, c] == x[b, c, h*ps + i, w*ps + j]
    xv = x.reshape(B, Cp, Wh2, ps, Ww, ps)                    # free view
    xw = jnp.transpose(xv, (0, 3, 5, 2, 4, 1)).reshape(B, K, Wh2, Ww, Cp)

    in_block = K * tWh * Ww * Cp * itemsize
    out_block = tWh * Ww * Cp * itemsize
    vmem_limit = int(min(48 * 1024 * 1024,
                         max(16 * 1024 * 1024, 3 * (in_block + out_block))))

    kernel = functools.partial(patch_embed_kernel, pool_k=K, c_real=C)
    out_tok = pl.pallas_call(
        kernel,
        out_shape=jax.ShapeDtypeStruct((B, Wh2, Ww, Cp), x.dtype),
        grid=(B, Wh2 // tWh),
        in_specs=[
            pl.BlockSpec((1, K, tWh, Ww, Cp), lambda b, h: (b, 0, h, 0, 0)),
            pl.BlockSpec((1, Cp), lambda b, h: (0, 0)),
            pl.BlockSpec((1, Cp), lambda b, h: (0, 0)),
        ],
        out_specs=pl.BlockSpec((1, tWh, Ww, Cp), lambda b, h: (b, h, 0, 0)),
        compiler_params=pltpu.CompilerParams(
            dimension_semantics=("parallel", "parallel"),
            vmem_limit_bytes=vmem_limit),
    )(xw, gamma2, beta2)

    # TODO(synk): if the downstream consumer accepts NHWC / (B, N, C) tokens,
    # return out_tok[:, :Wh, :, :C] directly and skip this output transpose.
    out = out_tok[:, :Wh, :, :C]
    return jnp.transpose(out, (0, 3, 1, 2))


def patch_embed_reference(x, gamma, beta, patch_size=4):
    """Pure-JAX reference with the exact PyTorch forward semantics (type='pool')."""
    B, C, H, W = x.shape
    ps = patch_size
    pad_h = (-H) % ps
    pad_w = (-W) % ps
    x = jnp.pad(x, ((0, 0), (0, 0), (0, pad_h), (0, pad_w)))
    Hp, Wp = H + pad_h, W + pad_w
    Wh, Ww = Hp // ps, Wp // ps

    xr = x.reshape(B, C, Wh, ps, Ww, ps)
    mx = jnp.max(xr, axis=(3, 5))
    av = jnp.mean(xr, axis=(3, 5))
    y = 0.5 * (mx + av)                               # (B, C, Wh, Ww)

    t = y.reshape(B, C, Wh * Ww).transpose(0, 2, 1)   # (B, N, C)
    mu = t.mean(-1, keepdims=True)
    var = ((t - mu) ** 2).mean(-1, keepdims=True)
    t = (t - mu) / jnp.sqrt(var + LN_EPS) * gamma.reshape(1, 1, C) + beta.reshape(1, 1, C)
    return t.transpose(0, 2, 1).reshape(B, C, Wh, Ww)


if __name__ == "__main__":
    patch_size = 4
    key = jax.random.PRNGKey(0)

    def check(B, C, H, W):
        kx, kg, kb = jax.random.split(jax.random.fold_in(key, C * 1000 + H), 3)
        x = jax.random.normal(kx, (B, C, H, W), jnp.float32)
        gamma = 1.0 + 0.05 * jax.random.normal(kg, (C,), jnp.float32)
        beta = 0.05 * jax.random.normal(kb, (C,), jnp.float32)

        out = jax.block_until_ready(patch_embed_forward(x, gamma, beta, patch_size))
        Wh, Ww = _cdiv(H, patch_size), _cdiv(W, patch_size)
        assert out.shape == (B, C, Wh, Ww), out.shape
        assert out.dtype == x.dtype
        ref = jax.block_until_ready(patch_embed_reference(x, gamma, beta, patch_size))
        err = float(jnp.max(jnp.abs(out - ref)))
        assert err < 1e-3, f"max abs error too large: {err}"

    # Module-default dim=96 (type='pool' requires in_ch == dim): exercises the
    # channel-padding (96 -> 128 lanes) path.
    check(B=2, C=96, H=16, W=16)
    # Lane-full channels with non-divisible spatial dims: exercises the H/W
    # zero-padding and row-tile padding paths.
    check(B=2, C=128, H=18, W=18)

    print("KERNEL_OK")
</pallas_src>

<mosaic_0001>
module attributes {stable_mosaic.version = 11 : i64} {
  func.func @patch_embed_kernel(%arg0: i32, %arg1: i32, %arg2: memref<1x16x2x4x128xf32, #tpu.memory_space<vmem>>, %arg3: memref<1x128xf32, #tpu.memory_space<vmem>>, %arg4: memref<1x128xf32, #tpu.memory_space<vmem>>, %arg5: memref<1x2x4x128xf32, #tpu.memory_space<vmem>>) attributes {dimension_semantics = [#tpu.dimension_semantics<parallel>, #tpu.dimension_semantics<parallel>], iteration_bounds = array<i64: 2, 2>, scalar_prefetch = 0 : i64, scratch_operands = 0 : i64, tpu.core_type = #tpu.core_type<tc>, window_params = [{transform_indices = @transform_0, window_bounds = array<i64: 1, 16, 2, 4, 128>}, {pipeline_mode = #tpu.pipeline_mode<synchronous>, transform_indices = @transform_1, window_bounds = array<i64: 1, 128>}, {pipeline_mode = #tpu.pipeline_mode<synchronous>, transform_indices = @transform_2, window_bounds = array<i64: 1, 128>}, {transform_indices = @transform_3, window_bounds = array<i64: 1, 2, 4, 128>}]} {
    %c0 = arith.constant 0 : index
    %c0_0 = arith.constant 0 : index
    %c0_1 = arith.constant 0 : index
    %c0_2 = arith.constant 0 : index
    %c0_3 = arith.constant 0 : index
    %0 = vector.load %arg2[%c0, %c0_0, %c0_1, %c0_2, %c0_3] : memref<1x16x2x4x128xf32, #tpu.memory_space<vmem>>, vector<1x1x2x4x128xf32>
    %1 = vector.shape_cast %0 : vector<1x1x2x4x128xf32> to vector<2x4x128xf32>
    %c0_4 = arith.constant 0 : index
    %c1 = arith.constant 1 : index
    %c0_5 = arith.constant 0 : index
    %c0_6 = arith.constant 0 : index
    %c0_7 = arith.constant 0 : index
    %2 = vector.load %arg2[%c0_4, %c1, %c0_5, %c0_6, %c0_7] : memref<1x16x2x4x128xf32, #tpu.memory_space<vmem>>, vector<1x1x2x4x128xf32>
    %3 = vector.shape_cast %2 : vector<1x1x2x4x128xf32> to vector<2x4x128xf32>
    %4 = arith.maximumf %1, %3 : vector<2x4x128xf32>
    %5 = arith.addf %1, %3 : vector<2x4x128xf32>
    %c0_8 = arith.constant 0 : index
    %c2 = arith.constant 2 : index
    %c0_9 = arith.constant 0 : index
    %c0_10 = arith.constant 0 : index
    %c0_11 = arith.constant 0 : index
    %6 = vector.load %arg2[%c0_8, %c2, %c0_9, %c0_10, %c0_11] : memref<1x16x2x4x128xf32, #tpu.memory_space<vmem>>, vector<1x1x2x4x128xf32>
    %7 = vector.shape_cast %6 : vector<1x1x2x4x128xf32> to vector<2x4x128xf32>
    %8 = arith.maximumf %4, %7 : vector<2x4x128xf32>
    %9 = arith.addf %5, %7 : vector<2x4x128xf32>
    %c0_12 = arith.constant 0 : index
    %c3 = arith.constant 3 : index
    %c0_13 = arith.constant 0 : index
    %c0_14 = arith.constant 0 : index
    %c0_15 = arith.constant 0 : index
    %10 = vector.load %arg2[%c0_12, %c3, %c0_13, %c0_14, %c0_15] : memref<1x16x2x4x128xf32, #tpu.memory_space<vmem>>, vector<1x1x2x4x128xf32>
    %11 = vector.shape_cast %10 : vector<1x1x2x4x128xf32> to vector<2x4x128xf32>
    %12 = arith.maximumf %8, %11 : vector<2x4x128xf32>
    %13 = arith.addf %9, %11 : vector<2x4x128xf32>
    %c0_16 = arith.constant 0 : index
    %c4 = arith.constant 4 : index
    %c0_17 = arith.constant 0 : index
    %c0_18 = arith.constant 0 : index
    %c0_19 = arith.constant 0 : index
    %14 = vector.load %arg2[%c0_16, %c4, %c0_17, %c0_18, %c0_19] : memref<1x16x2x4x128xf32, #tpu.memory_space<vmem>>, vector<1x1x2x4x128xf32>
    %15 = vector.shape_cast %14 : vector<1x1x2x4x128xf32> to vector<2x4x128xf32>
    %16 = arith.maximumf %12, %15 : vector<2x4x128xf32>
    %17 = arith.addf %13, %15 : vector<2x4x128xf32>
    %c0_20 = arith.constant 0 : index
    %c5 = arith.constant 5 : index
    %c0_21 = arith.constant 0 : index
    %c0_22 = arith.constant 0 : index
    %c0_23 = arith.constant 0 : index
    %18 = vector.load %arg2[%c0_20, %c5, %c0_21, %c0_22, %c0_23] : memref<1x16x2x4x128xf32, #tpu.memory_space<vmem>>, vector<1x1x2x4x128xf32>
    %19 = vector.shape_cast %18 : vector<1x1x2x4x128xf32> to vector<2x4x128xf32>
    %20 = arith.maximumf %16, %19 : vector<2x4x128xf32>
    %21 = arith.addf %17, %19 : vector<2x4x128xf32>
    %c0_24 = arith.constant 0 : index
    %c6 = arith.constant 6 : index
    %c0_25 = arith.constant 0 : index
    %c0_26 = arith.constant 0 : index
    %c0_27 = arith.constant 0 : index
    %22 = vector.load %arg2[%c0_24, %c6, %c0_25, %c0_26, %c0_27] : memref<1x16x2x4x128xf32, #tpu.memory_space<vmem>>, vector<1x1x2x4x128xf32>
    %23 = vector.shape_cast %22 : vector<1x1x2x4x128xf32> to vector<2x4x128xf32>
    %24 = arith.maximumf %20, %23 : vector<2x4x128xf32>
    %25 = arith.addf %21, %23 : vector<2x4x128xf32>
    %c0_28 = arith.constant 0 : index
    %c7 = arith.constant 7 : index
    %c0_29 = arith.constant 0 : index
    %c0_30 = arith.constant 0 : index
    %c0_31 = arith.constant 0 : index
    %26 = vector.load %arg2[%c0_28, %c7, %c0_29, %c0_30, %c0_31] : memref<1x16x2x4x128xf32, #tpu.memory_space<vmem>>, vector<1x1x2x4x128xf32>
    %27 = vector.shape_cast %26 : vector<1x1x2x4x128xf32> to vector<2x4x128xf32>
    %28 = arith.maximumf %24, %27 : vector<2x4x128xf32>
    %29 = arith.addf %25, %27 : vector<2x4x128xf32>
    %c0_32 = arith.constant 0 : index
    %c8 = arith.constant 8 : index
    %c0_33 = arith.constant 0 : index
    %c0_34 = arith.constant 0 : index
    %c0_35 = arith.constant 0 : index
    %30 = vector.load %arg2[%c0_32, %c8, %c0_33, %c0_34, %c0_35] : memref<1x16x2x4x128xf32, #tpu.memory_space<vmem>>, vector<1x1x2x4x128xf32>
    %31 = vector.shape_cast %30 : vector<1x1x2x4x128xf32> to vector<2x4x128xf32>
    %32 = arith.maximumf %28, %31 : vector<2x4x128xf32>
    %33 = arith.addf %29, %31 : vector<2x4x128xf32>
    %c0_36 = arith.constant 0 : index
    %c9 = arith.constant 9 : index
    %c0_37 = arith.constant 0 : index
    %c0_38 = arith.constant 0 : index
    %c0_39 = arith.constant 0 : index
    %34 = vector.load %arg2[%c0_36, %c9, %c0_37, %c0_38, %c0_39] : memref<1x16x2x4x128xf32, #tpu.memory_space<vmem>>, vector<1x1x2x4x128xf32>
    %35 = vector.shape_cast %34 : vector<1x1x2x4x128xf32> to vector<2x4x128xf32>
    %36 = arith.maximumf %32, %35 : vector<2x4x128xf32>
    %37 = arith.addf %33, %35 : vector<2x4x128xf32>
    %c0_40 = arith.constant 0 : index
    %c10 = arith.constant 10 : index
    %c0_41 = arith.constant 0 : index
    %c0_42 = arith.constant 0 : index
    %c0_43 = arith.constant 0 : index
    %38 = vector.load %arg2[%c0_40, %c10, %c0_41, %c0_42, %c0_43] : memref<1x16x2x4x128xf32, #tpu.memory_space<vmem>>, vector<1x1x2x4x128xf32>
    %39 = vector.shape_cast %38 : vector<1x1x2x4x128xf32> to vector<2x4x128xf32>
    %40 = arith.maximumf %36, %39 : vector<2x4x128xf32>
    %41 = arith.addf %37, %39 : vector<2x4x128xf32>
    %c0_44 = arith.constant 0 : index
    %c11 = arith.constant 11 : index
    %c0_45 = arith.constant 0 : index
    %c0_46 = arith.constant 0 : index
    %c0_47 = arith.constant 0 : index
    %42 = vector.load %arg2[%c0_44, %c11, %c0_45, %c0_46, %c0_47] : memref<1x16x2x4x128xf32, #tpu.memory_space<vmem>>, vector<1x1x2x4x128xf32>
    %43 = vector.shape_cast %42 : vector<1x1x2x4x128xf32> to vector<2x4x128xf32>
    %44 = arith.maximumf %40, %43 : vector<2x4x128xf32>
    %45 = arith.addf %41, %43 : vector<2x4x128xf32>
    %c0_48 = arith.constant 0 : index
    %c12 = arith.constant 12 : index
    %c0_49 = arith.constant 0 : index
    %c0_50 = arith.constant 0 : index
    %c0_51 = arith.constant 0 : index
    %46 = vector.load %arg2[%c0_48, %c12, %c0_49, %c0_50, %c0_51] : memref<1x16x2x4x128xf32, #tpu.memory_space<vmem>>, vector<1x1x2x4x128xf32>
    %47 = vector.shape_cast %46 : vector<1x1x2x4x128xf32> to vector<2x4x128xf32>
    %48 = arith.maximumf %44, %47 : vector<2x4x128xf32>
    %49 = arith.addf %45, %47 : vector<2x4x128xf32>
    %c0_52 = arith.constant 0 : index
    %c13 = arith.constant 13 : index
    %c0_53 = arith.constant 0 : index
    %c0_54 = arith.constant 0 : index
    %c0_55 = arith.constant 0 : index
    %50 = vector.load %arg2[%c0_52, %c13, %c0_53, %c0_54, %c0_55] : memref<1x16x2x4x128xf32, #tpu.memory_space<vmem>>, vector<1x1x2x4x128xf32>
    %51 = vector.shape_cast %50 : vector<1x1x2x4x128xf32> to vector<2x4x128xf32>
    %52 = arith.maximumf %48, %51 : vector<2x4x128xf32>
    %53 = arith.addf %49, %51 : vector<2x4x128xf32>
    %c0_56 = arith.constant 0 : index
    %c14 = arith.constant 14 : index
    %c0_57 = arith.constant 0 : index
    %c0_58 = arith.constant 0 : index
    %c0_59 = arith.constant 0 : index
    %54 = vector.load %arg2[%c0_56, %c14, %c0_57, %c0_58, %c0_59] : memref<1x16x2x4x128xf32, #tpu.memory_space<vmem>>, vector<1x1x2x4x128xf32>
    %55 = vector.shape_cast %54 : vector<1x1x2x4x128xf32> to vector<2x4x128xf32>
    %56 = arith.maximumf %52, %55 : vector<2x4x128xf32>
    %57 = arith.addf %53, %55 : vector<2x4x128xf32>
    %c0_60 = arith.constant 0 : index
    %c15 = arith.constant 15 : index
    %c0_61 = arith.constant 0 : index
    %c0_62 = arith.constant 0 : index
    %c0_63 = arith.constant 0 : index
    %58 = vector.load %arg2[%c0_60, %c15, %c0_61, %c0_62, %c0_63] : memref<1x16x2x4x128xf32, #tpu.memory_space<vmem>>, vector<1x1x2x4x128xf32>
    %59 = vector.shape_cast %58 : vector<1x1x2x4x128xf32> to vector<2x4x128xf32>
    %60 = arith.maximumf %56, %59 : vector<2x4x128xf32>
    %61 = arith.addf %57, %59 : vector<2x4x128xf32>
    %cst = arith.constant 6.250000e-02 : f32
    %62 = vector.broadcast %cst : f32 to vector<2x4x128xf32>
    %63 = arith.mulf %61, %62 : vector<2x4x128xf32>
    %64 = arith.addf %60, %63 : vector<2x4x128xf32>
    %cst_64 = arith.constant 5.000000e-01 : f32
    %65 = vector.broadcast %cst_64 : f32 to vector<2x4x128xf32>
    %66 = arith.mulf %65, %64 : vector<2x4x128xf32>
    %cst_65 = arith.constant dense<0.000000e+00> : vector<2x4xf32>
    %67 = vector.multi_reduction <add>, %66, %cst_65 [2] : vector<2x4x128xf32> to vector<2x4xf32>
    %68 = vector.shape_cast %67 : vector<2x4xf32> to vector<2x4x1xf32>
    %cst_66 = arith.constant 0.010416667 : f32
    %69 = vector.broadcast %cst_66 : f32 to vector<2x4x1xf32>
    %70 = arith.mulf %68, %69 : vector<2x4x1xf32>
    %71 = arith.mulf %66, %66 : vector<2x4x128xf32>
    %cst_67 = arith.constant dense<0.000000e+00> : vector<2x4xf32>
    %72 = vector.multi_reduction <add>, %71, %cst_67 [2] : vector<2x4x128xf32> to vector<2x4xf32>
    %73 = vector.shape_cast %72 : vector<2x4xf32> to vector<2x4x1xf32>
    %cst_68 = arith.constant 0.010416667 : f32
    %74 = vector.broadcast %cst_68 : f32 to vector<2x4x1xf32>
    %75 = arith.mulf %73, %74 : vector<2x4x1xf32>
    %76 = arith.mulf %70, %70 : vector<2x4x1xf32>
    %77 = arith.subf %75, %76 : vector<2x4x1xf32>
    %cst_69 = arith.constant 0.000000e+00 : f32
    %78 = vector.broadcast %cst_69 : f32 to vector<2x4x1xf32>
    %79 = arith.maximumf %77, %78 : vector<2x4x1xf32>
    %80 = vector.broadcast %70 : vector<2x4x1xf32> to vector<2x4x128xf32>
    %81 = arith.subf %66, %80 : vector<2x4x128xf32>
    %cst_70 = arith.constant 9.99999974E-6 : f32
    %82 = vector.broadcast %cst_70 : f32 to vector<2x4x1xf32>
    %83 = arith.addf %79, %82 : vector<2x4x1xf32>
    %84 = math.rsqrt %83 : vector<2x4x1xf32>
    %85 = vector.broadcast %84 : vector<2x4x1xf32> to vector<2x4x128xf32>
    %86 = arith.mulf %81, %85 : vector<2x4x128xf32>
    %c0_71 = arith.constant 0 : index
    %c0_72 = arith.constant 0 : index
    %87 = vector.load %arg3[%c0_71, %c0_72] : memref<1x128xf32, #tpu.memory_space<vmem>>, vector<1x128xf32>
    %88 = vector.shape_cast %87 : vector<1x128xf32> to vector<1x1x128xf32>
    %89 = vector.broadcast %88 : vector<1x1x128xf32> to vector<2x4x128xf32>
    %90 = arith.mulf %86, %89 : vector<2x4x128xf32>
    %c0_73 = arith.constant 0 : index
    %c0_74 = arith.constant 0 : index
    %91 = vector.load %arg4[%c0_73, %c0_74] : memref<1x128xf32, #tpu.memory_space<vmem>>, vector<1x128xf32>
    %92 = vector.shape_cast %91 : vector<1x128xf32> to vector<1x1x128xf32>
    %93 = vector.broadcast %92 : vector<1x1x128xf32> to vector<2x4x128xf32>
    %94 = arith.addf %90, %93 : vector<2x4x128xf32>
    %c0_75 = arith.constant 0 : index
    %c0_76 = arith.constant 0 : index
    %c0_77 = arith.constant 0 : index
    %c0_78 = arith.constant 0 : index
    %95 = vector.load %arg5[%c0_75, %c0_76, %c0_77, %c0_78] : memref<1x2x4x128xf32, #tpu.memory_space<vmem>>, vector<1x2x4x128xf32>
    %96 = vector.shape_cast %95 : vector<1x2x4x128xf32> to vector<2x4x128xf32>
    %97 = vector.shape_cast %94 : vector<2x4x128xf32> to vector<1x2x4x128xf32>
    tpu.vector_store %arg5[%c0_75, %c0_76, %c0_77, %c0_78], %97 {strides = array<i32>} : memref<1x2x4x128xf32, #tpu.memory_space<vmem>>, vector<1x2x4x128xf32>,
    return
  }
  func.func @transform_0(%arg0: i32, %arg1: i32) -> (i32, i32, i32, i32, i32) {
    %c0_i32 = arith.constant 0 : i32
    %c0_i32_0 = arith.constant 0 : i32
    %c0_i32_1 = arith.constant 0 : i32
    %c0_i32_2 = arith.constant 0 : i32
    return %arg0, %c0_i32, %arg1, %c0_i32_0, %c0_i32_1 : i32, i32, i32, i32, i32
  }
  func.func @transform_1(%arg0: i32, %arg1: i32) -> (i32, i32) {
    %c0_i32 = arith.constant 0 : i32
    %c0_i32_0 = arith.constant 0 : i32
    %c0_i32_1 = arith.constant 0 : i32
    return %c0_i32, %c0_i32_0 : i32, i32
  }
  func.func @transform_2(%arg0: i32, %arg1: i32) -> (i32, i32) {
    %c0_i32 = arith.constant 0 : i32
    %c0_i32_0 = arith.constant 0 : i32
    %c0_i32_1 = arith.constant 0 : i32
    return %c0_i32, %c0_i32_0 : i32, i32
  }
  func.func @transform_3(%arg0: i32, %arg1: i32) -> (i32, i32, i32, i32) {
    %c0_i32 = arith.constant 0 : i32
    %c0_i32_0 = arith.constant 0 : i32
    %c0_i32_1 = arith.constant 0 : i32
    return %arg0, %arg1, %c0_i32, %c0_i32_0 : i32, i32, i32, i32
  }
}

</mosaic_0001>

<bundles_post_ra>
// kernel: tpu_custom_call.1
= control target key start
LH: loop header
LB: loop body
LE: loop exit
PB: predicated region body
PF: predicated region fallthrough
CT: control target
= control target key end

     0   :  { %8 = vsyncpa [#allocation3], 0  ;;  %s992_s0 = inlined_call_operand.hbm [shape: f32[2,16,4,4,128], index: 0, kind: input, shape index: {}]   ;;  %s993_s1 = inlined_call_operand.vmem [shape: f32[1,128], index: 1, kind: input, shape index: {}]   ;;  %s994_s2 = inlined_call_operand.vmem [shape: f32[1,128], index: 2, kind: input, shape index: {}]   ;;  %s995_s3 = inlined_call_operand.hbm [shape: f32[2,4,4,128], index: 3, kind: output, shape index: {}]  }
   0x1   :  { %10 = vsyncpa [#allocation3 + $0x1], 0 }
   0x2   :  { %11 = vsyncpa [#allocation4], 0 }
   0x3   :  { %13 = vsyncpa [#allocation4 + $0x1], 0  ;;  %s778_s12 = smov 0   ;;  %s780_s13 = smov 0  }
   0x4   :  { %s782_s14 = smov 0   ;;  %s784_s15 = smov 0  }
   0x5   :  { %s786_s16 = smov 0   ;;  %s788_s17 = smov 0  }
   0x6   :  { %s790_s18 = smov 0   ;;  %s792_s19 = smov 0  }
   0x7 LB: > { %s506_s20 = sadd.s32 4294967295, %s747_s19   ;;  %s507_s21 = sadd.s32 4294967294, %s747_s19   ;;  %s747_s19 = sphi %s792_s19, %s19_s19   ;;  %s743_s18 = sphi %s790_s18, %s1012_s18   ;;  %s739_s17 = sphi %s788_s17, %s1011_s17   ;;  %s735_s16 = sphi %s786_s16, %s1010_s16   ;;  %s731_s15 = sphi %s784_s15, %s1009_s15   ;;  %s727_s14 = sphi %s782_s14, %s1008_s14   ;;  %s723_s13 = sphi %s780_s13, %s1007_s13   ;;  %s719_s12 = sphi %s778_s12, %s1006_s12  }
   0x8   : > { %s28_s22 = sadd.s32 1, %s739_s17  ;;  %s31_s23 = sadd.s32 1, %s743_s18 }
   0x9   : > { %p29_p0 = scmp.ge.s32.totalorder %s28_s22, 2  ;;  %p47_p1 = scmp.ne.s32.totalorder %s727_s14, %s723_s13 }
   0xa   : > { %p48_p2 = scmp.eq.s32.totalorder %s747_s19, 0  ;;  %p53_p5 = scmp.ne.s32.totalorder %s723_s13, %s719_s12 }
   0xb   : > { %s1014_s22 = smov (%p29_p0, %s28_s22), 0  ;;  %s1016_s23 = smov (!%p29_p0, %s31_s23), %s743_s18 }
   0xc   : > { %998 = sst [smem:[#allocation11_spill]] %s1014_s22  ;;  %s36_s24 = ssub.s32 %s739_s17, %s1014_s22 }
   0xd   : > { %p830_p3 = por %p48_p2, %p47_p1  ;;  %p33_p4 = scmp.ge.s32.totalorder %s1016_s23, 2 }
   0xe   : > { %p54_p6 = scmp.eq.s32.totalorder %s506_s20, 0  ;;  %p121_p7 = scmp.eq.s32.totalorder %s506_s20, 3 }
   0xf   : > { %s1018_s23 = smov (%p33_p4, %s1016_s23), 0  ;;  %p127_p10 = scmp.eq.s32.totalorder %s507_s21, 3 }
  0x10   : > { %1000 = sst [smem:[#allocation12_spill]] %s1018_s23  ;;  %p838_p8 = por %p54_p6, %p53_p5 }
  0x11   : > { %p842_p9 = por %p121_p7, %p47_p1  ;;  %s35_s28 = ssub.s32 %s743_s18, %s1018_s23 }
  0x12   : > { %s37_s29 = sor.u32 %s36_s24, %s35_s28  ;;  %s40_s30 = sadd.s32 1, %s727_s14 }
  0x13   : > { %p38_p11 = scmp.eq.s32.totalorder %s37_s29, 0  ;;  %p849_p12 = por %p127_p10, %p53_p5 }
  0x14   : > { %p509_p13 = scmp.ge.s32.totalorder %s747_s19, 4 }
  0x15   : > { %s854_s5 = scalar_select %p38_p11, %s727_s14, %s40_s30  }
  0x16   : > { %149 = sbr.rel (%p509_p13) target bundleno = 45 (0x2d), region = 24 }
  0x1d   : > { %s153_s6 = sand.u32 1, %s727_s14   ;;  %s511_s7 = sshll.u32 %s739_s17, 1 }
  0x1e   : > { %s510_s8 = sshll.u32 %s153_s6, 7  ;;  %s512_s9 = sshll.u32 %s743_s18, 6 }
  0x1f   : > { %s163_s10 = sadd.s32 %s512_s9, %s511_s7  ;;  %s157_s11 = scalar_lea.vmem [#allocation2], %s510_s8 }
  0x20   : > { %s178_s20 = sshll.u32 %s157_s11, 4  ;;  %s513_s21 = sshll.u32 %s163_s10, 6  ;;  %s179_s20 = int_to_ptr.vmem [resolvable:$true] %s178_s20 }
  0x21   : > { %s557_s24 = scalar_select %p830_p3, [#allocation0], [#allocation8] }
  0x22   : > { %s749_s28 = smov 256   ;;  %s750_s30 = smov 128  }
  0x23   : > { %558 = sst [smem:[#allocation7]] (%p830_p3), %s749_s28  ;;  %s751_s23 = smov 2  }
  0x24   : > { %s170_s29 = sld [smem:[%s557_s24]]   ;;  %s752_s7 = smov 64  }
  0x25   : > { %559 = sst [smem:[#allocation7 + $0x1]] (%p830_p3), %s750_s30  ;;  %s165_s10 = scalar_lea.hbm %s992_s0, %s513_s21 }
  0x26   : > { %560 = sst [smem:[#allocation7 + $0x2]] (%p830_p3), %s751_s23  ;;  %s753_s11 = smov 4  }
  0x27   : > { %561 = sst [smem:[#allocation7 + $0x3]] (%p830_p3), %s752_s7  ;;  %s154_s22 = scalar_lea.sflag [#allocation3], %s153_s6 }
  0x28   : > { %562 = sst [smem:[#allocation7 + $0x4]] (%p830_p3), %s752_s7  ;;  %s754_s30 = smov [#allocation6]  }
  0x29   : > { %563 = sst [smem:[#allocation7 + $0x5]] (%p830_p3), %s753_s11 }
  0x2a   : > { %s514_s24 = sshll.u32 %s170_s29, 26 }
  0x2b   : > { %s515_s28 = sadd.s32 134217728, %s514_s24 }
  0x2c   : > { %564 = dma.general (%p830_p3), %s165_s10, 2048, %s179_s20, %s154_s22, %s754_s30, [#allocation7], %s515_s28, 0  }
  0x2d PF: > { %p516_p0 = scmp.ge.s32.totalorder %s747_s19, 1  ;;  %p199_p1 = scmp.lt.s32.totalorder %s747_s19, 5 }
  0x2f   : > { %p200_p2 = pnand %p516_p0, %p199_p1 }
  0x30   : > { %s882_s23 = sand.u32 (!%p200_p2), 1, %s723_s13  }
  0x31   : > { %203 = sbr.rel (%p200_p2) target bundleno = 283 (0x11b), region = 32  ;;  %s517_s21 = sshll.u32 (!%p200_p2), %s882_s23, 7 }
  0x32   : > { %s206_s29 = scalar_lea.sflag (!%p200_p2), [#allocation3], %s882_s23  ;;  %s886_s7 = scalar_lea.vmem (!%p200_p2), [#allocation2], %s517_s21 }
  0x38   : > { %710 = dma.done.wait (%p838_p8), %s206_s29, 2048  }
  0x39   : > { %712 = vsyncadd (%p838_p8), %s206_s29, 4294965248  ;;  %v234_v0 = vld [vmem:[%s886_s7] sm:$0xf]  ;;  %v519_v1 = vld [vmem:[%s886_s7 + $0x8] sm:$0xf]  ;;  %vm347_vm0 = vcmask 1043456  }
  0x3a   : > { %v521_v2 = vld [vmem:[%s886_s7 + $0x10] sm:$0xf]  ;;  %v239_v3 = vmax.f32 %v234_v0, %v519_v1  ;;  %v241_v4 = vadd.f32 %v519_v1, %v234_v0  ;;  %v523_v5 = vld [vmem:[%s886_s7 + $0x18] sm:$0xf]  ;;  %v525_v8 = vld [vmem:[%s886_s7 + $0x20] sm:$0xf] }
  0x3b   : > { %v235_v11 = vld [vmem:[%s886_s7 + $0x4] sm:$0xf]  ;;  %v520_v12 = vld [vmem:[%s886_s7 + $0xc] sm:$0xf]  ;;  %v527_v13 = vld [vmem:[%s886_s7 + $0x28] sm:$0xf] }
  0x3c   : > { %v246_v6 = vmax.f32 %v239_v3, %v521_v2  ;;  %v248_v7 = vadd.f32 %v521_v2, %v241_v4  ;;  %v240_v14 = vmax.f32 %v235_v11, %v520_v12  ;;  %v242_v15 = vadd.f32 %v520_v12, %v235_v11  ;;  %v522_v16 = vld [vmem:[%s886_s7 + $0x14] sm:$0xf]  ;;  %v524_v19 = vld [vmem:[%s886_s7 + $0x1c] sm:$0xf]  ;;  %v529_v20 = vld [vmem:[%s886_s7 + $0x30] sm:$0xf] }
  0x3d   : > { %v526_v25 = vld [vmem:[%s886_s7 + $0x24] sm:$0xf]  ;;  %v531_v26 = vld [vmem:[%s886_s7 + $0x38] sm:$0xf]  ;;  %v528_v31 = vld [vmem:[%s886_s7 + $0x2c] sm:$0xf] }
  0x3e   : > { %v253_v9 = vmax.f32 %v246_v6, %v523_v5  ;;  %v255_v10 = vadd.f32 %v523_v5, %v248_v7  ;;  %v247_v21 = vmax.f32 %v240_v14, %v522_v16  ;;  %v249_v22 = vadd.f32 %v522_v16, %v242_v15  ;;  %v533_v32 = vld [vmem:[%s886_s7 + $0x40] sm:$0xf]  ;;  %v530_v37 = vld [vmem:[%s886_s7 + $0x34] sm:$0xf]  ;;  %v535_v38 = vld [vmem:[%s886_s7 + $0x48] sm:$0xf] }
  0x3f   : > { %v532_v43 = vld [vmem:[%s886_s7 + $0x3c] sm:$0xf]  ;;  %v537_v44 = vld [vmem:[%s886_s7 + $0x50] sm:$0xf]  ;;  %v534_v49 = vld [vmem:[%s886_s7 + $0x44] sm:$0xf] }
  0x40   : > { %v260_v17 = vmax.f32 %v253_v9, %v525_v8  ;;  %v262_v18 = vadd.f32 %v525_v8, %v255_v10  ;;  %v254_v27 = vmax.f32 %v247_v21, %v524_v19  ;;  %v256_v28 = vadd.f32 %v524_v19, %v249_v22  ;;  %v539_v50 = vld [vmem:[%s886_s7 + $0x58] sm:$0xf]  ;;  %v536_v55 = vld [vmem:[%s886_s7 + $0x4c] sm:$0xf]  ;;  %v541_v56 = vld [vmem:[%s886_s7 + $0x60] sm:$0xf] }
  0x41   : > { %v538_v61 = vld [vmem:[%s886_s7 + $0x54] sm:$0xf]  ;;  %v543_v62 = vld [vmem:[%s886_s7 + $0x68] sm:$0xf]  ;;  %v540_v3 = vld [vmem:[%s886_s7 + $0x5c] sm:$0xf] }
  0x42   : > { %v267_v23 = vmax.f32 %v260_v17, %v527_v13  ;;  %v269_v24 = vadd.f32 %v527_v13, %v262_v18  ;;  %v261_v33 = vmax.f32 %v254_v27, %v526_v25  ;;  %v263_v34 = vadd.f32 %v526_v25, %v256_v28  ;;  %v545_v4 = vld [vmem:[%s886_s7 + $0x70] sm:$0xf]  ;;  %v542_v9 = vld [vmem:[%s886_s7 + $0x64] sm:$0xf]  ;;  %v547_v10 = vld [vmem:[%s886_s7 + $0x78] sm:$0xf] }
  0x43   : > { %v544_v15 = vld [vmem:[%s886_s7 + $0x6c] sm:$0xf]  ;;  %s552_s26 = sshll.u32 %s731_s15, 1  ;;  %s553_s6 = sshll.u32 %s735_s16, 2 }
  0x44   : > { %v274_v29 = vmax.f32 %v267_v23, %v529_v20  ;;  %v276_v30 = vadd.f32 %v529_v20, %v269_v24  ;;  %v268_v39 = vmax.f32 %v261_v33, %v528_v31  ;;  %v270_v40 = vadd.f32 %v528_v31, %v263_v34  ;;  %v546_v20 = vld [vmem:[%s886_s7 + $0x74] sm:$0xf]  ;;  %v548_v24 = vld [vmem:[%s886_s7 + $0x7c] sm:$0xf]  ;;  %s518_s20 = sshll.u32 %s882_s23, 3  ;;  %s413_s10 = sadd.s32 %s553_s6, %s552_s26 }
  0x45   : > { %s554_s11 = sshll.u32 %s413_s10, 6  ;;  %s231_s24 = scalar_lea.vmem [#allocation5], %s518_s20 }
  0x46   : > { %v281_v35 = vmax.f32 %v274_v29, %v531_v26  ;;  %v283_v36 = vadd.f32 %v531_v26, %v276_v30  ;;  %v275_v45 = vmax.f32 %v268_v39, %v530_v37  ;;  %v277_v46 = vadd.f32 %v530_v37, %v270_v40  ;;  %s416_s28 = sshll.u32 %s231_s24, 4  ;;  %s936_s30 = scalar_lea.hbm %s995_s3, %s554_s11  ;;  %s938_s28 = int_to_ptr.vmem [resolvable:$true] %s416_s28 }
  0x47   : > { %s401_s21 = scalar_lea.sflag [#allocation4], %s882_s23  ;;  %s649_s29 = scalar_lea.vmem %s938_s28, 128 }
  0x48   : > { %v288_v41 = vmax.f32 %v281_v35, %v533_v32  ;;  %v290_v42 = vadd.f32 %v533_v32, %v283_v36  ;;  %v282_v51 = vmax.f32 %v275_v45, %v532_v43  ;;  %v284_v52 = vadd.f32 %v532_v43, %v277_v46  ;;  %p650_p3 = scmp.ne.s32.totalorder %s938_s28, %s649_s29  ;;  %s755_s7 = smov [#allocation5]  }
  0x49   : > { %s653_s22 = sshll.u32 %s755_s7, 4  ;;  %s654_s22 = int_to_ptr.vmem [resolvable:$false] %s653_s22 }
  0x4a   : > { %v295_v47 = vmax.f32 %v288_v41, %v535_v38  ;;  %v297_v48 = vadd.f32 %v535_v38, %v290_v42  ;;  %v289_v57 = vmax.f32 %v282_v51, %v534_v49  ;;  %v291_v58 = vadd.f32 %v534_v49, %v284_v52  ;;  %p651_p4 = pnand %p650_p3, %p842_p9  ;;  %s655_s25 = scalar_lea.vmem %s654_s22, 256 }
  0x4b   : > { %p656_p6 = scmp.lt.s32.totalorder %s938_s28, %s654_s22  ;;  %p657_p7 = scmp.lt.s32.totalorder %s655_s25, %s649_s29 }
  0x4c   : > { %v302_v53 = vmax.f32 %v295_v47, %v537_v44  ;;  %v304_v54 = vadd.f32 %v537_v44, %v297_v48  ;;  %v296_v63 = vmax.f32 %v289_v57, %v536_v55  ;;  %v298_v0 = vadd.f32 %v536_v55, %v291_v58  ;;  %v549_v58 = vld [vmem:[%s993_s1] ss:$0 sm:$0xff]  ;;  %p652_p5 = pneg %p651_p4 }
  0x4d   : > { %p658_p8 = por %p657_p7, %p656_p6 }
  0x4e   : > { %v309_v59 = vmax.f32 %v302_v53, %v539_v50  ;;  %v311_v60 = vadd.f32 %v539_v50, %v304_v54  ;;  %v303_v5 = vmax.f32 %v296_v63, %v538_v61  ;;  %v305_v6 = vadd.f32 %v538_v61, %v298_v0 }
  0x4f   : > { %p659_p10 = pnand %p658_p8, %p652_p5 }
  0x50   : > { %v316_v1 = vmax.f32 %v309_v59, %v541_v56  ;;  %v318_v2 = vadd.f32 %v541_v56, %v311_v60  ;;  %v310_v11 = vmax.f32 %v303_v5, %v540_v3  ;;  %v312_v12 = vadd.f32 %v540_v3, %v305_v6  ;;  %v550_v60 = vld [vmem:[%s994_s2] ss:$0 sm:$0xff] }
  0x52   : > { %v323_v7 = vmax.f32 %v316_v1, %v543_v62  ;;  %v325_v8 = vadd.f32 %v543_v62, %v318_v2  ;;  %v317_v16 = vmax.f32 %v310_v11, %v542_v9  ;;  %v319_v17 = vadd.f32 %v542_v9, %v312_v12 }
  0x54   : > { %v330_v13 = vmax.f32 %v323_v7, %v545_v4  ;;  %v332_v14 = vadd.f32 %v545_v4, %v325_v8  ;;  %v324_v21 = vmax.f32 %v317_v16, %v544_v15  ;;  %v326_v22 = vadd.f32 %v544_v15, %v319_v17 }
  0x56   : > { %v337_v18 = vmax.f32 %v330_v13, %v547_v10  ;;  %v339_v19 = vadd.f32 %v547_v10, %v332_v14  ;;  %v331_v25 = vmax.f32 %v324_v21, %v546_v20  ;;  %v333_v26 = vadd.f32 %v546_v20, %v326_v22 }
  0x58   : > { %v341_v23 = vmul.f32 0.0625, %v339_v19  ;;  %v338_v28 = vmax.f32 %v331_v25, %v548_v24  ;;  %v340_v29 = vadd.f32 %v548_v24, %v333_v26 }
  0x5a   : > { %v343_v27 = vadd.f32 %v341_v23, %v337_v18  ;;  %v342_v31 = vmul.f32 0.0625, %v340_v29 }
  0x5c   : > { %v345_v30 = vmul.f32 0.5, %v343_v27  ;;  %v344_v34 = vadd.f32 %v342_v31, %v338_v28 }
  0x5e   : > { %v348_v32 = vsel %vm347_vm0, %v345_v30, 0.0  ;;  %v356_v33 = vmul.f32 %v345_v30, %v345_v30  ;;  %v346_v36 = vmul.f32 0.5, %v344_v34 }
  0x5f   : > { %349 = vadd.xlane.f32.xlu0 %v348_v32 }
  0x60   : > { %v358_v35 = vsel %vm347_vm0, %v356_v33, 0.0  ;;  %v351_v37 = vsel %vm347_vm0, %v346_v36, 0.0  ;;  %v357_v38 = vmul.f32 %v346_v36, %v346_v36 }
  0x61   : > { %359 = vadd.xlane.f32.xlu1 %v358_v35 }
  0x62   : > { %v361_v39 = vsel %vm347_vm0, %v357_v38, 0.0 }
  0x63   : > { %352 = vadd.xlane.f32.xlu0 %v351_v37 }
  0x65   : > { %362 = vadd.xlane.f32.xlu1 %v361_v39 }
  0xec   : > { %v350_v40 = vpop.xlane.xlu0 %349 }
  0xed   : > { %v354_v41 = vmul.f32 0.010416667, %v350_v40 }
  0xee   : > { %v360_v42 = vpop.xlane.xlu1 %359 }
  0xef   : > { %v366_v43 = vmul.f32 %v354_v41, %v354_v41  ;;  %v364_v44 = vmul.f32 0.010416667, %v360_v42  ;;  %v372_v56 = vsub.f32 %v345_v30, %v354_v41 }
  0xf0   : > { %v353_v46 = vpop.xlane.xlu0 %352 }
  0xf1   : > { %v368_v45 = vsub.f32 %v364_v44, %v366_v43  ;;  %v355_v47 = vmul.f32 0.010416667, %v353_v46 }
  0xf2   : > { %v363_v49 = vpop.xlane.xlu1 %362 }
  0xf3   : > { %v370_v48 = vmax.f32 %v368_v45, 0.0  ;;  %v367_v50 = vmul.f32 %v355_v47, %v355_v47  ;;  %v365_v51 = vmul.f32 0.010416667, %v363_v49  ;;  %v373_v62 = vsub.f32 %v346_v36, %v355_v47 }
  0xf5   : > { %v374_v52 = vadd.f32 1e-05, %v370_v48  ;;  %v369_v53 = vsub.f32 %v365_v51, %v367_v50 }
  0xf7   : > { %645 = vrsqrt.f32 %v374_v52  ;;  %v371_v54 = vmax.f32 %v369_v53, 0.0 }
  0xf9   : > { %v375_v55 = vadd.f32 1e-05, %v371_v54 }
  0xfb   : > { %647 = vrsqrt.f32 %v375_v55 }
 0x101   : > { %v646_v57 = vpop.eup %645 }
 0x102   : > { %v378_v59 = vmul.f32 %v646_v57, %v372_v56 }
 0x104   : > { %v387_v61 = vmul.f32 %v549_v58, %v378_v59 }
 0x105   : > { %v648_v63 = vpop.eup %647 }
 0x106   : > { %v396_v0 = vadd.f32 %v550_v60, %v387_v61  ;;  %v379_v1 = vmul.f32 %v648_v63, %v373_v62 }
 0x108   : > { %398 = vst [vmem:[%s231_s24] sm:$0xf] %v396_v0  ;;  %v388_v2 = vmul.f32 %v549_v58, %v379_v1 }
 0x10a   : > { %v397_v3 = vadd.f32 %v550_v60, %v388_v2 }
 0x10c   : > { %399 = vst [vmem:[%s231_s24 + $0x4] sm:$0xf] %v397_v3 }
 0x10d   : > { %662 = shalt.err (!%p659_p10)
}
 0x10e   : > { %s663_s26 = scalar_lea.hbm %s936_s30, 128  ;;  %s667_s8 = scalar_lea.hbm %s995_s3, 512 }
 0x10f   : > { %p664_p11 = scmp.ne.s32.totalorder %s936_s30, %s663_s26  ;;  %p668_p1 = scmp.lt.u32.totalorder %s936_s30, %s995_s3 }
 0x110   : > { %p669_p2 = scmp.lt.u32.totalorder %s667_s8, %s663_s26  ;;  %p671_p4 = scmp.lt.u32.totalorder %s663_s26, %s936_s30 }
 0x111   : > { %p665_p13 = pnand %p664_p11, %p842_p9 }
 0x112   : > { %p670_p3 = por %p669_p2, %p668_p1 }
 0x113   : > { %p666_p0 = pneg %p665_p13 }
 0x114   : > { %p672_p5 = por %p671_p4, %p670_p3 }
 0x116   : > { %p673_p6 = pnand %p672_p5, %p666_p0 }
 0x118   : > { %676 = shalt.err (!%p673_p6)
}
 0x119   : > { %s756_s11 = smov 64   ;;  %s757_s24 = smov 4  }
 0x11a   : > { %566 = dma.vmem_to_hbm [thread:$0]  (%p842_p9), %s938_s28, 128, %s936_s30, %s401_s21, %s756_s11, %s756_s11, %s757_s24  }
 0x11b PF: > { %p572_p7 = scmp.ge.s32.totalorder %s747_s19, 2  ;;  %s431_s15 = sand.u32 1, %s719_s12  }
 0x11c   : > { %s432_s16 = scalar_lea.sflag [#allocation4], %s431_s15 }
 0x11d   : > { %p569_p8 = pnand %p572_p7, %p849_p12 }
 0x11f   : > { %714 = dma.done.wait (!%p569_p8), %s432_s16, 128  }
 0x120   : > { %716 = vsyncadd (!%p569_p8), %s432_s16, 4294967168  ;;  %s19_s19 = sadd.s32 1, %s747_s19   ;;  %s1004_s27 = sld [smem:[#allocation11_spill]] }
 0x121   : > { %p16_p10 = scmp.ge.s32.totalorder %s19_s19, 6   ;;  %s1005_s23 = sld [smem:[#allocation12_spill]] }
 0x122   : > { %s1006_s12 = smov %s723_s13  ;;  %s1007_s13 = smov %s727_s14 }
 0x123   : > { %s1008_s14 = smov %s854_s5  ;;  %s1009_s15 = smov %s739_s17 }
 0x124   : > { %s1010_s16 = smov %s743_s18  ;;  %18 = sbr.rel (!%p16_p10) target bundleno = 7 (0x7), region = 97 }
 0x126   : > { %s1011_s17 = smov %s1004_s27 }
 0x127   : > { %s1012_s18 = smov %s1005_s23 }
 0x12b   :  { %437 = vsyncpa [#allocation3], 1 }
 0x12c   :  { %439 = vsyncpa [#allocation3 + $0x1], 1 }
 0x12d   :  { %440 = vsyncpa [#allocation4], 1 }
 0x12e   :  { %442 = vsyncpa [#allocation4 + $0x1], 1 }

</bundles_post_ra>
